<compile_context>
chip_gen: v7x
topology: tpu7x:2x2x1
jax: 0.10.0
libtpu: 0.0.40
codegen_flags: <defaults>
</compile_context>

<pallas_src>
import functools

import jax
import jax.numpy as jnp
from jax.experimental import pallas as pl
from jax.experimental.pallas import tpu as pltpu

EMBED_DIM = 64    # module default embed_dim
OUTPUT_DIM = 1    # module default output_dim

_NEG_BIG = -10000000.0   # exact constant from the PyTorch module
_LANE = 128
_MIB = 1024 * 1024


# --------------------------------------------------------------------------
# chip-dependent tiling defaults
# --------------------------------------------------------------------------
def _chip_defaults():
    """(target block bytes, tensorcores per chip, vmem limit bytes)."""
    kind = ""
    try:
        kind = jax.devices()[0].device_kind.lower()
    except Exception:
        pass
    if ("v5 lite" in kind) or ("v5e" in kind) or ("v5lite" in kind):
        return 3 * _MIB, 1, 48 * _MIB      # 820 GB/s HBM, 1 TC, 128 MiB VMEM
    if "v6" in kind:
        return 4 * _MIB, 1, 64 * _MIB      # 1.4 TB/s HBM, 1 TC, 128 MiB VMEM
    if ("v7" in kind) or ("tpu7" in kind):
        return 6 * _MIB, 2, 48 * _MIB      # 3.2 TB/s HBM, 2 TC, 64 MiB VMEM
    return 4 * _MIB, 2, 48 * _MIB          # conservative default (e.g. v4/v5p)


def _choose_tb(batch, row_bytes, target_bytes, num_tc):
    """Batch rows per block: big (amortize ~0.35us/step), sublane aligned,
    and >= num_tc grid steps only when the chip actually has 2 TCs."""
    if batch <= 8:
        return batch
    tb = max(8, target_bytes // max(1, row_bytes))
    if num_tc > 1:
        tb = min(tb, max(8, batch // num_tc))
    if tb >= batch:
        return batch
    return max(8, (tb // 8) * 8)


# --------------------------------------------------------------------------
# in-kernel helpers
# --------------------------------------------------------------------------
def _split_bf16(v_f32):
    """Exact-ish two-term bf16 split of an f32 value (residual ~2^-17)."""
    hi = v_f32.astype(jnp.bfloat16)
    lo = (v_f32 - hi.astype(jnp.float32)).astype(jnp.bfloat16)
    return hi, lo


def _logits_pad(x_ref, whi_ref, wlo_ref, bias):
    """Linear(E -> 1) on the MXU.  x_ref: [TB, S*E] (native dtype),
    whi/wlo: [S*E, PAD] bf16 block-diagonal hi/lo parts of the torch weight.
    Returns [TB, PAD] f32; columns >= S just hold `bias` (masked later)."""
    xv = x_ref[...]
    whi = whi_ref[...]
    wlo = wlo_ref[...]
    if xv.dtype == jnp.bfloat16:
        acc = jnp.dot(xv, whi, preferred_element_type=jnp.float32)
        acc = acc + jnp.dot(xv, wlo, preferred_element_type=jnp.float32)
    else:
        xf = xv.astype(jnp.float32)
        xhi, xlo = _split_bf16(xf)
        acc = jnp.dot(xhi, whi, preferred_element_type=jnp.float32)
        acc = acc + jnp.dot(xhi, wlo, preferred_element_type=jnp.float32)
        acc = acc + jnp.dot(xlo, whi, preferred_element_type=jnp.float32)
    return acc + bias


def _softmax_pad(t, n_valid):
    """Softmax over the first n_valid lanes of t [TB, PAD]; padded lanes get
    exactly zero weight."""
    lane = jax.lax.broadcasted_iota(jnp.int32, t.shape, 1)
    t = jnp.where(lane < n_valid, t, jnp.float32(-1e30))
    m = jnp.max(t, axis=-1, keepdims=True)
    e = jnp.exp(t - m)
    d = jnp.sum(e, axis=-1, keepdims=True)
    inv = pl.reciprocal(d, approx=True)        # EUP slot
    inv = inv * (2.0 - d * inv)                # one Newton step -> f32 accuracy
    return e * inv                             # [TB, PAD]


def _aggregate(x_ref, w_pad, tsel_ref, seq, embed):
    """out[b, e] = sum_s x[b, s, e] * w[b, s]  without sublane reductions.
    w_pad: [TB, PAD] f32 softmax weights (lanes >= seq are exactly 0).
    tsel:  [PAD, S*E] bf16 0/1 selector, row s covers lanes s*E..s*E+E-1."""
    whi, wlo = _split_bf16(w_pad)
    tsel = tsel_ref[...]
    wt = jnp.dot(whi, tsel, preferred_element_type=jnp.float32)
    wt = wt + jnp.dot(wlo, tsel, preferred_element_type=jnp.float32)   # [TB, S*E]

    prod = x_ref[...].astype(jnp.float32) * wt                          # [TB, S*E]

    se = seq * embed
    if se % _LANE == 0 and _LANE % embed == 0:
        # sum the 128-lane vreg columns (pure VALU) ...
        c = prod[:, 0:_LANE]
        for j in range(1, se // _LANE):
            c = c + prod[:, j * _LANE:(j + 1) * _LANE]
        # ... then fold within a column down to E lanes (log2(128/E) steps).
        width = _LANE
        while width > embed:
            half = width // 2
            c = c[:, :half] + c[:, half:width]
            width = half
        return c
    # generic fallback (odd S*E / E): direct per-s accumulation.
    acc = prod[:, 0:embed]
    for s in range(1, seq):
        acc = acc + prod[:, s * embed:(s + 1) * embed]
    return acc


# --------------------------------------------------------------------------
# kernels
# --------------------------------------------------------------------------
def _attention_kernel(x_ref, whi_ref, wlo_ref, tsel_ref, b_ref, o_ref, *,
                      seq, embed):
    t = jnp.tanh(_logits_pad(x_ref, whi_ref, wlo_ref, b_ref[0]))   # [TB, PAD]
    w = _softmax_pad(t, seq)                                       # [TB, PAD]
    o_ref[...] = _aggregate(x_ref, w, tsel_ref, seq, embed).astype(o_ref.dtype)


def _attention_masked_kernel(x_ref, madd_ref, whi_ref, wlo_ref, tsel_ref,
                             b_ref, o_ref, *, seq, embed):
    t = jnp.tanh(_logits_pad(x_ref, whi_ref, wlo_ref, b_ref[0]))   # [TB, PAD]
    t = t + madd_ref[...]                                          # additive mask
    w = _softmax_pad(t, seq)
    w = jnp.where(jnp.isnan(w), jnp.float32(0.0), w)
    o_ref[...] = _aggregate(x_ref, w, tsel_ref, seq, embed).astype(o_ref.dtype)


# --------------------------------------------------------------------------
# wrapper
# --------------------------------------------------------------------------
def attention_forward(x, lin_weight, lin_bias, mask=None, *, block_rows=None):
    """x: [B, S, E] (f32 or bf16), lin_weight: torch-style [1, E],
    lin_bias: [1], mask: optional [B, S].  Returns [B, E] float32."""
    B, S, E = x.shape
    SE = S * E
    PAD = ((S + _LANE - 1) // _LANE) * _LANE

    # ---- constants (tiny, resident in VMEM) ----
    w = lin_weight.reshape(-1).astype(jnp.float32)                  # [E]
    w_hi = w.astype(jnp.bfloat16)
    w_lo = (w - w_hi.astype(jnp.float32)).astype(jnp.bfloat16)

    eye_sp = jnp.eye(S, PAD, dtype=jnp.float32)                     # [S, PAD]

    def _blockdiag(wvec):
        m = eye_sp[:, None, :] * wvec.astype(jnp.float32)[None, :, None]
        return m.reshape(SE, PAD)                                   # [S*E, PAD]

    whi = _blockdiag(w_hi).astype(jnp.bfloat16)
    wlo = _blockdiag(w_lo).astype(jnp.bfloat16)
    # lane-tiling selector: row s -> ones on lanes s*E..s*E+E-1, rows >= S zero
    tsel = jnp.repeat(jnp.eye(PAD, S, dtype=jnp.float32), E, axis=1)
    tsel = tsel.astype(jnp.bfloat16)                                # [PAD, S*E]

    bias = lin_bias.reshape(1).astype(jnp.float32)

    # ---- lane-dense x ----
    x2 = x.reshape(B, SE)

    # ---- tiling ----
    target_bytes, num_tc, vmem_limit = _chip_defaults()
    row_bytes = SE * jnp.dtype(x.dtype).itemsize
    tb = block_rows if block_rows is not None else _choose_tb(
        B, row_bytes, target_bytes, num_tc)
    tb = min(tb, B)
    grid = (pl.cdiv(B, tb),)

    cp = pltpu.CompilerParams(
        dimension_semantics=("parallel",),
        vmem_limit_bytes=vmem_limit,
    )

    x_spec = pl.BlockSpec((tb, SE), lambda i: (i, 0))
    whi_spec = pl.BlockSpec((SE, PAD), lambda i: (0, 0))
    wlo_spec = pl.BlockSpec((SE, PAD), lambda i: (0, 0))
    tsel_spec = pl.BlockSpec((PAD, SE), lambda i: (0, 0))
    b_spec = pl.BlockSpec(memory_space=pltpu.MemorySpace.SMEM)
    out_spec = pl.BlockSpec((tb, E), lambda i: (i, 0))
    out_shape = jax.ShapeDtypeStruct((B, E), jnp.float32)

    if mask is None:
        kernel = functools.partial(_attention_kernel, seq=S, embed=E)
        return pl.pallas_call(
            kernel,
            out_shape=out_shape,
            grid=grid,
            in_specs=[x_spec, whi_spec, wlo_spec, tsel_spec, b_spec],
            out_specs=out_spec,
            compiler_params=cp,
        )(x2, whi, wlo, tsel, bias)

    # additive mask computed on the ORIGINAL dtype (exact torch semantics),
    # padded to PAD lanes (padded lanes are forced to -1e30 inside the kernel).
    madd = jnp.where(mask.reshape(B, S) == 0,
                     jnp.float32(_NEG_BIG), jnp.float32(0.0))
    madd = jnp.pad(madd, ((0, 0), (0, PAD - S)))                    # [B, PAD]
    madd_spec = pl.BlockSpec((tb, PAD), lambda i: (i, 0))

    kernel = functools.partial(_attention_masked_kernel, seq=S, embed=E)
    return pl.pallas_call(
        kernel,
        out_shape=out_shape,
        grid=grid,
        in_specs=[x_spec, madd_spec, whi_spec, wlo_spec, tsel_spec, b_spec],
        out_specs=out_spec,
        compiler_params=cp,
    )(x2, madd, whi, wlo, tsel, bias)


# --------------------------------------------------------------------------
# pure-JAX reference (elementwise, full f32 accuracy)
# --------------------------------------------------------------------------
def _reference(x, w, b, mask=None):
    xf = x.astype(jnp.float32)
    wv = w.reshape(-1).astype(jnp.float32)
    logits = jnp.tanh(jnp.sum(xf * wv[None, None, :], axis=-1, keepdims=True)
                      + b.astype(jnp.float32))                      # [B, S, 1]
    if mask is None:
        weight = jax.nn.softmax(logits, axis=-2)
    else:
        add = jnp.where(mask == 0, _NEG_BIG, 0.0)
        weight = jax.nn.softmax(logits[..., 0] + add, axis=-1)[..., None]
        weight = jnp.where(jnp.isnan(weight), 0.0, weight)
    return jnp.sum(xf * weight, axis=1)                             # [B, E]


if __name__ == "__main__":
    S, E = 8, EMBED_DIM
    key = jax.random.PRNGKey(0)
    kx, kw, kb, km, kx2, km2 = jax.random.split(key, 6)

    bound = 1.0 / (E ** 0.5)
    lin_weight = jax.random.uniform(kw, (OUTPUT_DIM, E), jnp.float32, -bound, bound)
    lin_bias = jax.random.uniform(kb, (OUTPUT_DIM,), jnp.float32, -bound, bound)

    # ---- small case: B = 2 (single full block) ----
    B = 2
    x = jax.random.normal(kx, (B, S, E), dtype=jnp.float32)
    mask = (jax.random.uniform(km, (B, S)) > 0.3).astype(jnp.float32)

    out = jax.block_until_ready(attention_forward(x, lin_weight, lin_bias))
    ref = _reference(x, lin_weight, lin_bias)
    assert out.shape == (B, E)
    assert jnp.allclose(out, ref, atol=1e-4, rtol=1e-4), "unmasked mismatch (B=2)"

    out_m = jax.block_until_ready(attention_forward(x, lin_weight, lin_bias, mask=mask))
    ref_m = _reference(x, lin_weight, lin_bias, mask=mask)
    assert jnp.allclose(out_m, ref_m, atol=1e-4, rtol=1e-4), "masked mismatch (B=2)"

    # ---- multi-block grid with a partial last block: B = 20, tb = 8 ----
    B2 = 20
    x2 = jax.random.normal(kx2, (B2, S, E), dtype=jnp.float32)
    mask2 = (jax.random.uniform(km2, (B2, S)) > 0.3).astype(jnp.float32)

    out2 = jax.block_until_ready(
        attention_forward(x2, lin_weight, lin_bias, block_rows=8))
    ref2 = _reference(x2, lin_weight, lin_bias)
    assert jnp.allclose(out2, ref2, atol=1e-4, rtol=1e-4), "unmasked mismatch (B=20)"

    out2_m = jax.block_until_ready(
        attention_forward(x2, lin_weight, lin_bias, mask=mask2, block_rows=8))
    ref2_m = _reference(x2, lin_weight, lin_bias, mask=mask2)
    assert jnp.allclose(out2_m, ref2_m, atol=1e-4, rtol=1e-4), "masked mismatch (B=20)"

    # ---- auto-chosen block size path ----
    out3 = jax.block_until_ready(attention_forward(x2, lin_weight, lin_bias, mask=mask2))
    assert jnp.allclose(out3, ref2_m, atol=1e-4, rtol=1e-4), "masked mismatch (auto tb)"

    print("KERNEL_OK")
</pallas_src>

<mosaic_0001>
module attributes {stable_mosaic.version = 11 : i64} {
  func.func @_attention_kernel(%arg0: i32, %arg1: memref<2x512xf32, #tpu.memory_space<vmem>>, %arg2: memref<512x128xbf16, #tpu.memory_space<vmem>>, %arg3: memref<512x128xbf16, #tpu.memory_space<vmem>>, %arg4: memref<128x512xbf16, #tpu.memory_space<vmem>>, %arg5: memref<1xf32, #tpu.memory_space<smem>>, %arg6: memref<2x64xf32, #tpu.memory_space<vmem>>) attributes {dimension_semantics = [#tpu.dimension_semantics<parallel>], iteration_bounds = array<i64: 1>, scalar_prefetch = 0 : i64, scratch_operands = 0 : i64, tpu.core_type = #tpu.core_type<tc>, window_params = [{transform_indices = @transform_0, window_bounds = array<i64: 2, 512>}, {pipeline_mode = #tpu.pipeline_mode<synchronous>, transform_indices = @transform_1, window_bounds = array<i64: 512, 128>}, {pipeline_mode = #tpu.pipeline_mode<synchronous>, transform_indices = @transform_2, window_bounds = array<i64: 512, 128>}, {pipeline_mode = #tpu.pipeline_mode<synchronous>, transform_indices = @transform_3, window_bounds = array<i64: 128, 512>}, {transform_indices = @transform_4, window_bounds = array<i64: 1>}, {transform_indices = @transform_5, window_bounds = array<i64: 2, 64>}]} {
    %c0 = arith.constant 0 : index
    %0 = memref.load %arg5[%c0] : memref<1xf32, #tpu.memory_space<smem>>
    %c0_0 = arith.constant 0 : index
    %c0_1 = arith.constant 0 : index
    %1 = vector.load %arg1[%c0_0, %c0_1] : memref<2x512xf32, #tpu.memory_space<vmem>>, vector<2x512xf32>
    %c0_2 = arith.constant 0 : index
    %c0_3 = arith.constant 0 : index
    %2 = vector.load %arg2[%c0_2, %c0_3] : memref<512x128xbf16, #tpu.memory_space<vmem>>, vector<512x128xbf16>
    %c0_4 = arith.constant 0 : index
    %c0_5 = arith.constant 0 : index
    %3 = vector.load %arg3[%c0_4, %c0_5] : memref<512x128xbf16, #tpu.memory_space<vmem>>, vector<512x128xbf16>
    %4 = arith.truncf %1 : vector<2x512xf32> to vector<2x512xbf16>
    %5 = arith.extf %4 : vector<2x512xbf16> to vector<2x512xf32>
    %6 = arith.subf %1, %5 : vector<2x512xf32>
    %7 = arith.truncf %6 : vector<2x512xf32> to vector<2x512xbf16>
    %cst = arith.constant dense<0.000000e+00> : vector<2x128xf32>
    %8 = tpu.matmul %4, %2, %cst {dimension_numbers = #tpu.dot_dimension_numbers<[1], [0], [0], [1], [0, 0, 1, 1], [], []>} : vector<2x512xbf16>, vector<512x128xbf16>, vector<2x128xf32> -> vector<2x128xf32>
    %cst_6 = arith.constant dense<0.000000e+00> : vector<2x128xf32>
    %9 = tpu.matmul %4, %3, %cst_6 {dimension_numbers = #tpu.dot_dimension_numbers<[1], [0], [0], [1], [0, 0, 1, 1], [], []>} : vector<2x512xbf16>, vector<512x128xbf16>, vector<2x128xf32> -> vector<2x128xf32>
    %10 = arith.addf %8, %9 : vector<2x128xf32>
    %cst_7 = arith.constant dense<0.000000e+00> : vector<2x128xf32>
    %11 = tpu.matmul %7, %2, %cst_7 {dimension_numbers = #tpu.dot_dimension_numbers<[1], [0], [0], [1], [0, 0, 1, 1], [], []>} : vector<2x512xbf16>, vector<512x128xbf16>, vector<2x128xf32> -> vector<2x128xf32>
    %12 = arith.addf %10, %11 : vector<2x128xf32>
    %13 = vector.broadcast %0 : f32 to vector<2x128xf32>
    %14 = arith.addf %12, %13 : vector<2x128xf32>
    %15 = math.tanh %14 : vector<2x128xf32>
    %16 = tpu.iota {dimensions = array<i32: 1>} : vector<2x128xi32>
    %c8_i32 = arith.constant 8 : i32
    %17 = vector.broadcast %c8_i32 : i32 to vector<2x128xi32>
    %18 = arith.cmpi slt, %16, %17 : vector<2x128xi32>
    %cst_8 = arith.constant -1.000000e+30 : f32
    %19 = vector.broadcast %cst_8 : f32 to vector<2x128xf32>
    %20 = arith.select %18, %15, %19 : vector<2x128xi1>, vector<2x128xf32>
    %cst_9 = arith.constant dense<0xFF800000> : vector<2xf32>
    %21 = vector.multi_reduction <maximumf>, %20, %cst_9 [1] : vector<2x128xf32> to vector<2xf32>
    %22 = vector.shape_cast %21 : vector<2xf32> to vector<2x1xf32>
    %23 = vector.broadcast %22 : vector<2x1xf32> to vector<2x128xf32>
    %24 = arith.subf %20, %23 : vector<2x128xf32>
    %25 = math.exp %24 : vector<2x128xf32>
    %cst_10 = arith.constant dense<0.000000e+00> : vector<2xf32>
    %26 = vector.multi_reduction <add>, %25, %cst_10 [1] : vector<2x128xf32> to vector<2xf32>
    %27 = vector.shape_cast %26 : vector<2xf32> to vector<2x1xf32>
    %28 = tpu.reciprocal %27 {approx = true} : vector<2x1xf32> -> vector<2x1xf32>
    %29 = arith.mulf %27, %28 : vector<2x1xf32>
    %cst_11 = arith.constant 2.000000e+00 : f32
    %30 = vector.broadcast %cst_11 : f32 to vector<2x1xf32>
    %31 = arith.subf %30, %29 : vector<2x1xf32>
    %32 = arith.mulf %28, %31 : vector<2x1xf32>
    %33 = vector.broadcast %32 : vector<2x1xf32> to vector<2x128xf32>
    %34 = arith.mulf %25, %33 : vector<2x128xf32>
    %35 = arith.truncf %34 : vector<2x128xf32> to vector<2x128xbf16>
    %36 = arith.extf %35 : vector<2x128xbf16> to vector<2x128xf32>
    %37 = arith.subf %34, %36 : vector<2x128xf32>
    %38 = arith.truncf %37 : vector<2x128xf32> to vector<2x128xbf16>
    %c0_12 = arith.constant 0 : index
    %c0_13 = arith.constant 0 : index
    %39 = vector.load %arg4[%c0_12, %c0_13] : memref<128x512xbf16, #tpu.memory_space<vmem>>, vector<128x512xbf16>
    %cst_14 = arith.constant dense<0.000000e+00> : vector<2x512xf32>
    %40 = tpu.matmul %35, %39, %cst_14 {dimension_numbers = #tpu.dot_dimension_numbers<[1], [0], [0], [1], [0, 0, 1, 1], [], []>} : vector<2x128xbf16>, vector<128x512xbf16>, vector<2x512xf32> -> vector<2x512xf32>
    %cst_15 = arith.constant dense<0.000000e+00> : vector<2x512xf32>
    %41 = tpu.matmul %38, %39, %cst_15 {dimension_numbers = #tpu.dot_dimension_numbers<[1], [0], [0], [1], [0, 0, 1, 1], [], []>} : vector<2x128xbf16>, vector<128x512xbf16>, vector<2x512xf32> -> vector<2x512xf32>
    %42 = arith.addf %40, %41 : vector<2x512xf32>
    %c0_16 = arith.constant 0 : index
    %c0_17 = arith.constant 0 : index
    %43 = vector.load %arg1[%c0_16, %c0_17] : memref<2x512xf32, #tpu.memory_space<vmem>>, vector<2x512xf32>
    %44 = arith.mulf %43, %42 : vector<2x512xf32>
    %45 = vector.extract_strided_slice %44 {offsets = [0, 0], sizes = [2, 128], strides = [1, 1]} : vector<2x512xf32> to vector<2x128xf32>
    %46 = vector.extract_strided_slice %44 {offsets = [0, 128], sizes = [2, 128], strides = [1, 1]} : vector<2x512xf32> to vector<2x128xf32>
    %47 = arith.addf %45, %46 : vector<2x128xf32>
    %48 = vector.extract_strided_slice %44 {offsets = [0, 256], sizes = [2, 128], strides = [1, 1]} : vector<2x512xf32> to vector<2x128xf32>
    %49 = arith.addf %47, %48 : vector<2x128xf32>
    %50 = vector.extract_strided_slice %44 {offsets = [0, 384], sizes = [2, 128], strides = [1, 1]} : vector<2x512xf32> to vector<2x128xf32>
    %51 = arith.addf %49, %50 : vector<2x128xf32>
    %52 = vector.extract_strided_slice %51 {offsets = [0, 0], sizes = [2, 64], strides = [1, 1]} : vector<2x128xf32> to vector<2x64xf32>
    %53 = vector.extract_strided_slice %51 {offsets = [0, 64], sizes = [2, 64], strides = [1, 1]} : vector<2x128xf32> to vector<2x64xf32>
    %54 = arith.addf %52, %53 : vector<2x64xf32>
    %c0_18 = arith.constant 0 : index
    %c0_19 = arith.constant 0 : index
    %55 = vector.load %arg6[%c0_18, %c0_19] : memref<2x64xf32, #tpu.memory_space<vmem>>, vector<2x64xf32>
    tpu.vector_store %arg6[%c0_18, %c0_19], %54 {strides = array<i32>} : memref<2x64xf32, #tpu.memory_space<vmem>>, vector<2x64xf32>,
    return
  }
  func.func @transform_0(%arg0: i32) -> (i32, i32) {
    %c0_i32 = arith.constant 0 : i32
    %c0_i32_0 = arith.constant 0 : i32
    return %arg0, %c0_i32 : i32, i32
  }
  func.func @transform_1(%arg0: i32) -> (i32, i32) {
    %c0_i32 = arith.constant 0 : i32
    %c0_i32_0 = arith.constant 0 : i32
    %c0_i32_1 = arith.constant 0 : i32
    return %c0_i32, %c0_i32_0 : i32, i32
  }
  func.func @transform_2(%arg0: i32) -> (i32, i32) {
    %c0_i32 = arith.constant 0 : i32
    %c0_i32_0 = arith.constant 0 : i32
    %c0_i32_1 = arith.constant 0 : i32
    return %c0_i32, %c0_i32_0 : i32, i32
  }
  func.func @transform_3(%arg0: i32) -> (i32, i32) {
    %c0_i32 = arith.constant 0 : i32
    %c0_i32_0 = arith.constant 0 : i32
    %c0_i32_1 = arith.constant 0 : i32
    return %c0_i32, %c0_i32_0 : i32, i32
  }
  func.func @transform_4(%arg0: i32) -> i32 {
    %c0_i32 = arith.constant 0 : i32
    %c0_i32_0 = arith.constant 0 : i32
    return %c0_i32 : i32
  }
  func.func @transform_5(%arg0: i32) -> (i32, i32) {
    %c0_i32 = arith.constant 0 : i32
    %c0_i32_0 = arith.constant 0 : i32
    return %arg0, %c0_i32 : i32, i32
  }
}

</mosaic_0001>

<bundles_post_ra>
// kernel: tpu_custom_call.1
= control target key start
LH: loop header
LB: loop body
LE: loop exit
PB: predicated region body
PF: predicated region fallthrough
CT: control target
= control target key end

     0   :  { %11 = vsyncpa [#allocation4], 0  ;;  %s2127_s0 = inlined_call_operand.hbm [shape: f32[2,512], index: 0, kind: input, shape index: {}]   ;;  %s2128_s1 = inlined_call_operand.hbm [shape: bf16[512,128], index: 1, kind: input, shape index: {}]   ;;  %s2129_s2 = inlined_call_operand.hbm [shape: bf16[512,128], index: 2, kind: input, shape index: {}]   ;;  %s2130_s3 = inlined_call_operand.hbm [shape: bf16[128,512], index: 3, kind: input, shape index: {}]   ;;  %s2131_s4 = inlined_call_operand.<no memory space> [shape: f32[1], index: 4, kind: input, shape index: {}]   ;;  %s2132_s5 = inlined_call_operand.hbm [shape: f32[2,64], index: 5, kind: output, shape index: {}]  }
   0x1   :  { %12 = vsyncpa [#allocation7], 0 }
   0x2   :  { %13 = vsyncpa [#allocation10], 0 }
   0x3   :  { %14 = vsyncpa [#allocation5], 0  ;;  %s1833_s18 = smov [#allocation6]   ;;  %s1715_s22 = scalar_lea.hbm %s2128_s1, 4096 }
   0x4   :  { %s30_s19 = sshll.u32 %s1833_s18, 4  ;;  %p1716_p0 = scmp.ne.s32.totalorder %s2128_s1, %s1715_s22  ;;  %s31_s19 = int_to_ptr.vmem [resolvable:$true] %s30_s19 }
   0x5   :  { %p1719_p1 = scmp.lt.u32.totalorder %s1715_s22, %s2128_s1 }
   0x7   :  { %p1721_p2 = pnand %p1719_p1, %p1716_p0 }
   0x9   :  { %1724 = shalt.err (!%p1721_p2)
}
   0xa   :  { %s1725_s27 = scalar_lea.vmem %s31_s19, 4096  ;;  %p1730_p4 = scmp.lt.s32.totalorder %s31_s19, %s31_s19 }
   0xb   :  { %p1726_p3 = scmp.ne.s32.totalorder %s31_s19, %s1725_s27  ;;  %p1731_p5 = scmp.lt.s32.totalorder %s1725_s27, %s1725_s27 }
   0xd   :  { %p1732_p6 = por %p1731_p5, %p1730_p4 }
   0xf   :  { %p1733_p7 = pnand %p1732_p6, %p1726_p3 }
  0x11   :  { %1736 = shalt.err (!%p1733_p7)
}
  0x12   :  { %s1834_s28 = smov 64   ;;  %s1835_s29 = smov 4  }
  0x13   :  { %36 = dma.hbm_to_vmem [thread:$0]  %s2128_s1, 4096, %s31_s19, [#allocation7], %s1834_s28, %s1834_s28, %s1835_s29  }
  0x14   :  { %s1836_s7 = smov [#allocation3]   ;;  %s1837_s9 = smov [#allocation8]  }
  0x15   :  { %s21_s8 = sshll.u32 %s1836_s7, 4  ;;  %s42_s10 = sshll.u32 %s1837_s9, 4  ;;  %s22_s8 = int_to_ptr.vmem [resolvable:$true] %s21_s8  ;;  %s43_s10 = int_to_ptr.vmem [resolvable:$true] %s42_s10 }
  0x16   :  { %s1737_s13 = scalar_lea.hbm %s2127_s0, 128 }
  0x17   :  { %p1738_p8 = scmp.ne.s32.totalorder %s2127_s0, %s1737_s13  ;;  %p1741_p9 = scmp.lt.u32.totalorder %s1737_s13, %s2127_s0 }
  0x19   :  { %p1743_p10 = pnand %p1741_p9, %p1738_p8 }
  0x1b   :  { %1746 = shalt.err (!%p1743_p10)
}
  0x1c   :  { %s1747_s1 = scalar_lea.vmem %s22_s8, 128  ;;  %p1752_p12 = scmp.lt.s32.totalorder %s22_s8, %s22_s8 }
  0x1d   :  { %p1748_p11 = scmp.ne.s32.totalorder %s22_s8, %s1747_s1  ;;  %p1753_p13 = scmp.lt.s32.totalorder %s1747_s1, %s1747_s1 }
  0x1f   :  { %p1754_p0 = por %p1753_p13, %p1752_p12 }
  0x21   :  { %p1755_p1 = pnand %p1754_p0, %p1748_p11 }
  0x23   :  { %1758 = shalt.err (!%p1755_p1)
}
  0x24   :  { %24 = dma.hbm_to_vmem [thread:$0]  %s2127_s0, 128, %s22_s8, [#allocation4]  }
  0x25   :  { %s1759_s22 = scalar_lea.hbm %s2129_s2, 4096 }
  0x26   :  { %p1760_p2 = scmp.ne.s32.totalorder %s2129_s2, %s1759_s22  ;;  %p1763_p3 = scmp.lt.u32.totalorder %s1759_s22, %s2129_s2 }
  0x28   :  { %p1765_p4 = pnand %p1763_p3, %p1760_p2 }
  0x2a   :  { %1768 = shalt.err (!%p1765_p4)
}
  0x2b   :  { %s1769_s27 = scalar_lea.vmem %s43_s10, 4096  ;;  %p1774_p6 = scmp.lt.s32.totalorder %s43_s10, %s43_s10 }
  0x2c   :  { %p1770_p5 = scmp.ne.s32.totalorder %s43_s10, %s1769_s27  ;;  %p1775_p7 = scmp.lt.s32.totalorder %s1769_s27, %s1769_s27 }
  0x2e   :  { %p1776_p8 = por %p1775_p7, %p1774_p6 }
  0x30   :  { %p1777_p9 = pnand %p1776_p8, %p1770_p5 }
  0x32   :  { %1780 = shalt.err (!%p1777_p9)
}
  0x33   :  { %48 = dma.hbm_to_vmem [thread:$0]  %s2129_s2, 4096, %s43_s10, [#allocation7], %s1834_s28, %s1834_s28, %s1835_s29  }
  0x34   :  { %s1838_s6 = smov [#allocation9]   ;;  %s1781_s11 = scalar_lea.hbm %s2130_s3, 4096 }
  0x35   :  { %s54_s7 = sshll.u32 %s1838_s6, 4  ;;  %p1782_p10 = scmp.ne.s32.totalorder %s2130_s3, %s1781_s11  ;;  %s55_s7 = int_to_ptr.vmem [resolvable:$true] %s54_s7 }
  0x36   :  { %p1785_p11 = scmp.lt.u32.totalorder %s1781_s11, %s2130_s3 }
  0x38   :  { %p1787_p12 = pnand %p1785_p11, %p1782_p10 }
  0x3a   :  { %1790 = shalt.err (!%p1787_p12)
}
  0x3b   :  { %s1791_s16 = scalar_lea.vmem %s55_s7, 4096  ;;  %p1796_p0 = scmp.lt.s32.totalorder %s55_s7, %s55_s7 }
  0x3c   :  { %p1792_p13 = scmp.ne.s32.totalorder %s55_s7, %s1791_s16  ;;  %p1797_p1 = scmp.lt.s32.totalorder %s1791_s16, %s1791_s16 }
  0x3e   :  { %p1798_p2 = por %p1797_p1, %p1796_p0 }
  0x40   :  { %p1799_p3 = pnand %p1798_p2, %p1792_p13 }
  0x42   :  { %1802 = shalt.err (!%p1799_p3)
}
  0x43   :  { %s1839_s2 = smov 256   ;;  %s1840_s29 = smov 16  }
  0x44   :  { %60 = dma.hbm_to_vmem [thread:$0]  %s2130_s3, 4096, %s55_s7, [#allocation10], %s1839_s2, %s1839_s2, %s1840_s29  }
  0x45   :  { %1825 = dma.done.wait [#allocation4], 128  }
  0x46   :  { %1826 = vsyncadd [#allocation4], 4294967168 }
  0x47   :  { %1827 = dma.done.wait [#allocation7], 8192  }
  0x48   :  { %1828 = vsyncadd [#allocation7], 4294959104 }
  0x49   :  { %1829 = dma.done.wait [#allocation10], 4096  }
  0x4a   :  { %1830 = vsyncadd [#allocation10], 4294963200  ;;  %v1596_v0 = vld [vmem:[#allocation8 + $0x40] sm:$0xff]   ;;  %v1600_v4 = vld [vmem:[#allocation8 + $0x48] sm:$0xff]   ;;  %v1841_v22 = vmov 1983009808   ;;  %v211_v24 = vlaneseq }
  0x4b   :  { %v1597_v1 = vld [vmem:[#allocation8 + $0xc0] sm:$0xff]   ;;  %1445 = vmatprep.subr.bf16.mxu0 %v1596_v0  ;;  %v1601_v5 = vld [vmem:[#allocation8 + $0xc8] sm:$0xff]   ;;  %v1604_v8 = vld [vmem:[#allocation8 + $0x50] sm:$0xff]   ;;  %v209_v23 = vunpack.c.l.s4 %v1841_v22  ;;  %vm917_vm1 = vcmask 1041408   ;;  %vm1330_vm2 = vcmask 517120  }
  0x4c   :  { %v1598_v2 = vld [vmem:[#allocation8] sm:$0xff]   ;;  %1467 = vmatprep.subr.bf16.mxu1 %v1597_v1  ;;  %v1602_v6 = vld [vmem:[#allocation8 + $0x8] sm:$0xff]   ;;  %v1605_v9 = vld [vmem:[#allocation8 + $0xd0] sm:$0xff]   ;;  %v212_v30 = vshrl.u32 %v211_v24, 7 }
  0x4d   :  { %v1599_v3 = vld [vmem:[#allocation8 + $0x80] sm:$0xff]   ;;  %1446 = vmatpush3.bf16.msra.mxu0 %v1598_v2  ;;  %v1603_v7 = vld [vmem:[#allocation8 + $0x88] sm:$0xff]   ;;  %v1606_v10 = vld [vmem:[#allocation8 + $0x10] sm:$0xff]   ;;  %v210_v29 = vunpack.c.0.s8 %v209_v23 }
  0x4e   :  { %1468 = vmatpush3.bf16.msra.mxu1 %v1599_v3  ;;  %1447 = vmatprep.subr.bf16.mxu0 %v1600_v4  ;;  %v1607_v11 = vld [vmem:[#allocation8 + $0x90] sm:$0xff]   ;;  %v1608_v12 = vld [vmem:[#allocation8 + $0x58] sm:$0xff]   ;;  %v1612_v16 = vld [vmem:[#allocation8 + $0x60] sm:$0xff]  }
  0x4f   :  { %1469 = vmatprep.subr.bf16.mxu1 %v1601_v5  ;;  %v1609_v13 = vld [vmem:[#allocation8 + $0xd8] sm:$0xff]   ;;  %v1613_v17 = vld [vmem:[#allocation8 + $0xe0] sm:$0xff]   ;;  %v1616_v20 = vld [vmem:[#allocation8 + $0x68] sm:$0xff]   ;;  %v1929_v35 = vsub.s32 %v210_v29, %v212_v30 }
  0x50   :  { %v1610_v14 = vld [vmem:[#allocation8 + $0x18] sm:$0xff]   ;;  %v1614_v18 = vld [vmem:[#allocation8 + $0x20] sm:$0xff]   ;;  %v1617_v21 = vld [vmem:[#allocation8 + $0xe8] sm:$0xff]  }
  0x51   :  { %1448 = vmatpush3.bf16.msra.mxu0 %v1602_v6  ;;  %v1611_v15 = vld [vmem:[#allocation8 + $0x98] sm:$0xff]   ;;  %v1615_v19 = vld [vmem:[#allocation8 + $0xa0] sm:$0xff]   ;;  %v1618_v25 = vld [vmem:[#allocation8 + $0x28] sm:$0xff]  }
  0x52   :  { %1470 = vmatpush3.bf16.msra.mxu1 %v1603_v7  ;;  %1449 = vmatprep.subr.bf16.mxu0 %v1604_v8  ;;  %v1619_v26 = vld [vmem:[#allocation8 + $0xa8] sm:$0xff]   ;;  %v1620_v27 = vld [vmem:[#allocation8 + $0x70] sm:$0xff]   ;;  %v1624_v33 = vld [vmem:[#allocation8 + $0x78] sm:$0xff]  }
  0x53   :  { %1471 = vmatprep.subr.bf16.mxu1 %v1605_v9  ;;  %v1621_v28 = vld [vmem:[#allocation8 + $0xf0] sm:$0xff]   ;;  %v1625_v34 = vld [vmem:[#allocation8 + $0xf8] sm:$0xff]   ;;  %v1937_v41 = vld [vmem:[#allocation6 + $0x40] sm:$0xff]  }
  0x54   :  { %v1622_v31 = vld [vmem:[#allocation8 + $0x30] sm:$0xff]   ;;  %v1626_v36 = vld [vmem:[#allocation8 + $0x38] sm:$0xff]   ;;  %v1939_v42 = vld [vmem:[#allocation6 + $0xc0] sm:$0xff]  }
  0x55   :  { %1450 = vmatpush3.bf16.msra.mxu0 %v1606_v10  ;;  %v1623_v32 = vld [vmem:[#allocation8 + $0xb0] sm:$0xff]   ;;  %v1627_v37 = vld [vmem:[#allocation8 + $0xb8] sm:$0xff]   ;;  %v1946_v46 = vld [vmem:[#allocation6] sm:$0xff]  }
  0x56   :  { %1472 = vmatpush3.bf16.msra.mxu1 %v1607_v11  ;;  %1451 = vmatprep.subr.bf16.mxu0 %v1608_v12  ;;  %v1931_v38 = vld [vmem:[#allocation3] sm:$0xff]  ;;  %v1950_v50 = vld [vmem:[#allocation6 + $0x80] sm:$0xff]   ;;  %v1952_v51 = vld [vmem:[#allocation6 + $0x48] sm:$0xff]  }
  0x57   :  { %1473 = vmatprep.subr.bf16.mxu1 %v1609_v13  ;;  %v214_v39 = vrot.slane %v1931_v38, %v1929_v35  ;;  %v207_v40 = vcombine.high %v1931_v38, %v1931_v38  ;;  %v1956_v56 = vld [vmem:[#allocation6 + $0xc8] sm:$0xff]   ;;  %v1966_v60 = vld [vmem:[#allocation6 + $0x50] sm:$0xff]   ;;  %v1978_v2 = vld [vmem:[#allocation6 + $0x58] sm:$0xff]  }
  0x58   :  { %v1959_v57 = vld [vmem:[#allocation6 + $0x8] sm:$0xff]   ;;  %v1969_v63 = vld [vmem:[#allocation6 + $0xd0] sm:$0xff]   ;;  %v1981_v3 = vld [vmem:[#allocation6 + $0xd8] sm:$0xff]  }
  0x59   :  { %1452 = vmatpush3.bf16.msra.mxu0 %v1610_v14  ;;  %v222_v43 = vcombine.high %v214_v39, %v214_v39  ;;  %v221_v44 = vrot.slane %v207_v40, %v1929_v35  ;;  %v1943_v45 = vpack.c.bf16 %v214_v39, %v214_v39  ;;  %v1962_v59 = vld [vmem:[#allocation6 + $0x88] sm:$0xff]   ;;  %v1972_v0 = vld [vmem:[#allocation6 + $0x10] sm:$0xff]   ;;  %v1986_v6 = vld [vmem:[#allocation6 + $0x18] sm:$0xff]  }
  0x5a   :  { %1474 = vmatpush3.bf16.msra.mxu1 %v1611_v15  ;;  %1453 = vmatprep.subr.bf16.mxu0 %v1612_v16  ;;  %v1975_v1 = vld [vmem:[#allocation6 + $0x90] sm:$0xff]   ;;  %v1989_v7 = vld [vmem:[#allocation6 + $0x98] sm:$0xff]   ;;  %v1992_v8 = vld [vmem:[#allocation6 + $0x60] sm:$0xff]  }
  0x5b   :  { %1475 = vmatprep.subr.bf16.mxu1 %v1613_v17  ;;  %v229_v47 = vpack.c.bf16 %v222_v43, %v222_v43  ;;  %v223_v48 = vcombine.high %v221_v44, %v221_v44  ;;  %v1948_v49 = vpack.c.bf16 %v221_v44, %v221_v44  ;;  %v232_v54 = vunpack.c.l.bf16 %v1943_v45  ;;  %v1995_v9 = vld [vmem:[#allocation6 + $0xe0] sm:$0xff]   ;;  %v1649_v13 = vld [vmem:[#allocation6 + $0x68] sm:$0xff]   ;;  %v1656_v22 = vld [vmem:[#allocation6 + $0xb0] sm:$0xff]  }
  0x5c   :  { %v1647_v11 = vld [vmem:[#allocation6 + $0x20] sm:$0xff]   ;;  %v1650_v14 = vld [vmem:[#allocation6 + $0xe8] sm:$0xff]   ;;  %v1660_v29 = vld [vmem:[#allocation6 + $0xb8] sm:$0xff]  }
  0x5d   :  { %1454 = vmatpush3.bf16.msra.mxu0 %v1614_v18  ;;  %v233_v52 = vunpack.c.l.bf16 %v229_v47  ;;  %509 = vmatprep.mubr.bf16.mxu0 %v229_v47  ;;  %v231_v53 = vpack.c.bf16 %v223_v48, %v223_v48  ;;  %v234_v55 = vunpack.c.l.bf16 %v1948_v49  ;;  %v1648_v12 = vld [vmem:[#allocation6 + $0xa0] sm:$0xff]   ;;  %v1651_v16 = vld [vmem:[#allocation6 + $0x28] sm:$0xff]   ;;  %v1653_v18 = vld [vmem:[#allocation6 + $0x70] sm:$0xff]  }
  0x5e   :  { %1476 = vmatpush3.bf16.msra.mxu1 %v1615_v19  ;;  %1455 = vmatprep.subr.bf16.mxu0 %v1616_v20  ;;  %v1652_v17 = vld [vmem:[#allocation6 + $0xa8] sm:$0xff]   ;;  %v1654_v19 = vld [vmem:[#allocation6 + $0xf0] sm:$0xff]  }
  0x5f   :  { %1477 = vmatprep.subr.bf16.mxu1 %v1617_v21  ;;  %v235_v58 = vunpack.c.l.bf16 %v231_v53  ;;  %549 = vmatprep.mubr.bf16.mxu1 %v231_v53  ;;  %v240_v61 = vcombine.low %v232_v54, %v233_v52  ;;  %v1655_v21 = vld [vmem:[#allocation6 + $0x30] sm:$0xff]  }
  0x61   :  { %1456 = vmatpush3.bf16.msra.mxu0 %v1618_v25  ;;  %v241_v62 = vcombine.low %v234_v55, %v235_v58  ;;  %v248_v4 = vrot.slane %v240_v61, %v1929_v35  ;;  %v1657_v25 = vld [vmem:[#allocation6 + $0x78] sm:$0xff]  }
  0x62   :  { %1478 = vmatpush3.bf16.msra.mxu1 %v1619_v26  ;;  %1457 = vmatprep.subr.bf16.mxu0 %v1620_v27  ;;  %v1658_v26 = vld [vmem:[#allocation6 + $0xf8] sm:$0xff]  }
  0x63   :  { %1479 = vmatprep.subr.bf16.mxu1 %v1621_v28  ;;  %v255_v5 = vrot.slane %v241_v62, %v1929_v35  ;;  %v1659_v28 = vld [vmem:[#allocation6 + $0x38] sm:$0xff]  }
  0x65   :  { %1458 = vmatpush3.bf16.msra.mxu0 %v1622_v31  ;;  %v256_v10 = vcombine.low %v248_v4, %v255_v5 }
  0x66   :  { %1480 = vmatpush3.bf16.msra.mxu1 %v1623_v32  ;;  %1459 = vmatprep.subr.bf16.mxu0 %v1624_v33 }
  0x67   :  { %1481 = vmatprep.subr.bf16.mxu1 %v1625_v34  ;;  %v258_v15 = vsub.f32 %v1931_v38, %v256_v10 }
  0x69   :  { %1460 = vmatpush3.bf16.msra.mxu0 %v1626_v36  ;;  %v260_v20 = vcombine.high %v258_v15, %v258_v15  ;;  %v267_v23 = vrot.slane %v258_v15, %v1929_v35  ;;  %v2030_v15 = vld [vmem:[#allocation9] ss:$16 sps:$4 sm:$0xff]  }
  0x6a   :  { %1482 = vmatpush3.bf16.msra.mxu1 %v1627_v37  ;;  %1489 = vmatprep.subr.bf16.mxu0 %v1937_v41 }
  0x6b   :  { %1511 = vmatprep.subr.bf16.mxu1 %v1939_v42  ;;  %v274_v27 = vrot.slane %v260_v20, %v1929_v35  ;;  %v275_v30 = vcombine.high %v267_v23, %v267_v23  ;;  %v281_v34 = vpack.c.bf16 %v267_v23, %v267_v23  ;;  %v2045_v20 = vld [vmem:[#allocation9 + $0x20] ss:$16 sps:$4 sm:$0xff]  }
  0x6c   :  { %510 = vmatmul.mubr.bf16.vlgmr.msra.gmra.mrb[0].mxu0 %v1943_v45 }
  0x6d   :  { %1490 = vmatpush3.bf16.msra.mxu0 %v1946_v46  ;;  %550 = vmatmul.mubr.bf16.vlgmr.msra.gmra.mrb[0].mxu1 %v1948_v49  ;;  %v276_v31 = vcombine.high %v274_v27, %v274_v27  ;;  %v282_v32 = vpack.c.bf16 %v275_v30, %v275_v30  ;;  %v283_v36 = vpack.c.bf16 %v274_v27, %v274_v27  ;;  %v2059_v30 = vld [vmem:[#allocation9 + $0x40] ss:$16 sps:$4 sm:$0xff]  }
  0x6e   :  { %1491 = vmatprep.subr.bf16.mxu0 %v1952_v51  ;;  %1512 = vmatpush3.bf16.msra.mxu1 %v1950_v50 }
  0x6f   :  { %781 = vmatprep.mubr.bf16.mxu0 %v229_v47  ;;  %1513 = vmatprep.subr.bf16.mxu1 %v1956_v56  ;;  %v284_v33 = vpack.c.bf16 %v276_v31, %v276_v31  ;;  %v2061_v31 = vld [vmem:[#allocation9 + $0x48] ss:$16 sps:$4 sm:$0xff]  }
  0x70   :  { %821 = vmatprep.mubr.bf16.mxu1 %v231_v53 }
  0x71   :  { %1492 = vmatpush3.bf16.msra.mxu0 %v1959_v57 }
  0x72   :  { %1493 = vmatprep.subr.bf16.mxu0 %v1966_v60  ;;  %1514 = vmatpush3.bf16.msra.mxu1 %v1962_v59 }
  0x73   :  { %1515 = vmatprep.subr.bf16.mxu1 %v1969_v63 }
  0x75   :  { %1494 = vmatpush3.bf16.msra.mxu0 %v1972_v0 }
  0x76   :  { %1495 = vmatprep.subr.bf16.mxu0 %v1978_v2  ;;  %1516 = vmatpush3.bf16.msra.mxu1 %v1975_v1 }
  0x77   :  { %1517 = vmatprep.subr.bf16.mxu1 %v1981_v3 }
  0x79   :  { %1496 = vmatpush3.bf16.msra.mxu0 %v1986_v6 }
  0x7a   :  { %1497 = vmatprep.subr.bf16.mxu0 %v1992_v8  ;;  %1518 = vmatpush3.bf16.msra.mxu1 %v1989_v7 }
  0x7b   :  { %1519 = vmatprep.subr.bf16.mxu1 %v1995_v9 }
  0x7d   :  { %1498 = vmatpush3.bf16.msra.mxu0 %v1647_v11 }
  0x7e   :  { %1499 = vmatprep.subr.bf16.mxu0 %v1649_v13  ;;  %1520 = vmatpush3.bf16.msra.mxu1 %v1648_v12 }
  0x7f   :  { %1521 = vmatprep.subr.bf16.mxu1 %v1650_v14 }
  0x81   :  { %1500 = vmatpush3.bf16.msra.mxu0 %v1651_v16 }
  0x82   :  { %1501 = vmatprep.subr.bf16.mxu0 %v1653_v18  ;;  %1522 = vmatpush3.bf16.msra.mxu1 %v1652_v17 }
  0x83   :  { %1523 = vmatprep.subr.bf16.mxu1 %v1654_v19 }
  0x85   :  { %1502 = vmatpush3.bf16.msra.mxu0 %v1655_v21 }
  0x86   :  { %1503 = vmatprep.subr.bf16.mxu0 %v1657_v25  ;;  %1524 = vmatpush3.bf16.msra.mxu1 %v1656_v22 }
  0x87   :  { %1525 = vmatprep.subr.bf16.mxu1 %v1658_v26 }
  0x89   :  { %1504 = vmatpush3.bf16.msra.mxu0 %v1659_v28 }
  0x8a   :  { %1533 = vmatprep.subr.bf16.mxu0 %v1937_v41  ;;  %1526 = vmatpush3.bf16.msra.mxu1 %v1660_v29 }
  0x8b   :  { %1555 = vmatprep.subr.bf16.mxu1 %v1939_v42 }
  0x8c   :  { %782 = vmatmul.mubr.bf16.vlgmr.msra.gmra.mrb[4].mxu0 %v1943_v45 }
  0x8d   :  { %1534 = vmatpush3.bf16.msra.mxu0 %v1946_v46  ;;  %861 = vmatprep.mubr.bf16.mxu0 %v282_v32  ;;  %v2067_v32 = vld [vmem:[#allocation9 + $0x64] ss:$16 sps:$4 sm:$0xff]  }
  0x8e   :  { %822 = vmatmul.mubr.bf16.vlgmr.msra.gmra.mrb[4].mxu1 %v1948_v49  ;;  %1535 = vmatprep.subr.bf16.mxu0 %v1952_v51 }
  0x8f   :  { %1556 = vmatpush3.bf16.msra.mxu1 %v1950_v50  ;;  %901 = vmatprep.mubr.bf16.mxu1 %v284_v33  ;;  %v2069_v33 = vld [vmem:[#allocation9 + $0x6c] ss:$16 sps:$4 sm:$0xff]  }
  0x90   :  { %1557 = vmatprep.subr.bf16.mxu1 %v1956_v56 }
  0x91   :  { %1536 = vmatpush3.bf16.msra.mxu0 %v1959_v57 }
  0x92   :  { %1537 = vmatprep.subr.bf16.mxu0 %v1966_v60 }
  0x93   :  { %1558 = vmatpush3.bf16.msra.mxu1 %v1962_v59 }
  0x94   :  { %1559 = vmatprep.subr.bf16.mxu1 %v1969_v63 }
  0x95   :  { %1538 = vmatpush3.bf16.msra.mxu0 %v1972_v0 }
  0x96   :  { %1539 = vmatprep.subr.bf16.mxu0 %v1978_v2 }
  0x97   :  { %1560 = vmatpush3.bf16.msra.mxu1 %v1975_v1 }
  0x98   :  { %1561 = vmatprep.subr.bf16.mxu1 %v1981_v3 }
  0x99   :  { %1540 = vmatpush3.bf16.msra.mxu0 %v1986_v6 }
  0x9a   :  { %1541 = vmatprep.subr.bf16.mxu0 %v1992_v8  ;;  %v910_v8 = vstv %s2131_s4  ;;  %s1843_s4 = smov [#allocation11]  }
  0x9b   :  { %1562 = vmatpush3.bf16.msra.mxu1 %v1989_v7  ;;  %s1338_s18 = sshll.u32 %s1843_s4, 4  ;;  %s1339_s18 = int_to_ptr.vmem [resolvable:$true] %s1338_s18 }
  0x9c   :  { %1563 = vmatprep.subr.bf16.mxu1 %v1995_v9  ;;  %s1803_s19 = scalar_lea.vmem %s1339_s18, 32  ;;  %p1808_p5 = scmp.lt.s32.totalorder %s1339_s18, %s1339_s18 }
  0x9d   :  { %1542 = vmatpush3.bf16.msra.mxu0 %v1647_v11  ;;  %v914_v11 = vand.u32 127, %v211_v24  ;;  %v2041_v24 = vld [vmem:[#allocation9 + $0x2c] ss:$16 sps:$4 sm:$0xff]   ;;  %p1804_p4 = scmp.ne.s32.totalorder %s1339_s18, %s1803_s19  ;;  %p1809_p6 = scmp.lt.s32.totalorder %s1803_s19, %s1803_s19 }
  0x9e   :  { %1543 = vmatprep.subr.bf16.mxu0 %v1649_v13 }
  0x9f   :  { %1564 = vmatpush3.bf16.msra.mxu1 %v1648_v12  ;;  %vm915_vm0 = vcmp.lt.s32.totalorder %v914_v11, 8  ;;  %p1810_p7 = por %p1809_p6, %p1808_p5 }
  0xa0   :  { %1565 = vmatprep.subr.bf16.mxu1 %v1650_v14 }
  0xa1   :  { %1544 = vmatpush3.bf16.msra.mxu0 %v1651_v16  ;;  %v2032_v16 = vld [vmem:[#allocation9 + $0x4] ss:$16 sps:$4 sm:$0xff]   ;;  %p1811_p8 = pnand %p1810_p7, %p1804_p4 }
  0xa2   :  { %1545 = vmatprep.subr.bf16.mxu0 %v1653_v18  ;;  %v2036_v18 = vld [vmem:[#allocation9 + $0xc] ss:$16 sps:$4 sm:$0xff]  }
  0xa3   :  { %1566 = vmatpush3.bf16.msra.mxu1 %v1652_v17  ;;  %v2034_v17 = vld [vmem:[#allocation9 + $0x8] ss:$16 sps:$4 sm:$0xff]  }
  0xa4   :  { %1567 = vmatprep.subr.bf16.mxu1 %v1654_v19  ;;  %v2038_v19 = vld [vmem:[#allocation9 + $0x24] ss:$16 sps:$4 sm:$0xff]  }
  0xa5   :  { %1546 = vmatpush3.bf16.msra.mxu0 %v1655_v21  ;;  %v2049_v21 = vld [vmem:[#allocation9 + $0x28] ss:$16 sps:$4 sm:$0xff]  }
  0xa6   :  { %1547 = vmatprep.subr.bf16.mxu0 %v1657_v25 }
  0xa7   :  { %1568 = vmatpush3.bf16.msra.mxu1 %v1656_v22 }
  0xa8   :  { %1569 = vmatprep.subr.bf16.mxu1 %v1658_v26 }
  0xa9   :  { %1548 = vmatpush3.bf16.msra.mxu0 %v1659_v28  ;;  %v2055_v28 = vld [vmem:[#allocation9 + $0x44] ss:$16 sps:$4 sm:$0xff]  }
  0xaa   :  { %1128 = vmatprep.subr.bf16.mxu0 %v2032_v16 }
  0xab   :  { %1570 = vmatpush3.bf16.msra.mxu1 %v1660_v29  ;;  %v2057_v29 = vld [vmem:[#allocation9 + $0x4c] ss:$16 sps:$4 sm:$0xff]  }
  0xac   :  { %862 = vmatmul.mubr.bf16.vlgmr.msra.gmra.mrb[8].mxu0 %v281_v34  ;;  %1169 = vmatprep.subr.bf16.mxu1 %v2036_v18  ;;  %v2071_v34 = vld [vmem:[#allocation9 + $0x60] ss:$16 sps:$4 sm:$0xff]  }
  0xad   :  { %1129 = vmatpush1.bf16.msra.mxu0 %v2030_v15 }
  0xae   :  { %902 = vmatmul.mubr.bf16.vlgmr.msra.gmra.mrb[8].mxu1 %v283_v36  ;;  %1130 = vmatprep.subr.bf16.mxu0 %v2038_v19  ;;  %v2073_v36 = vld [vmem:[#allocation9 + $0x68] ss:$16 sps:$4 sm:$0xff]  }
  0xaf   :  { %1170 = vmatpush1.bf16.msra.mxu1 %v2034_v17 }
  0xb0   :  { %1171 = vmatprep.subr.bf16.mxu1 %v2041_v24 }
  0xb1   :  { %1131 = vmatpush1.bf16.msra.mxu0 %v2045_v20 }
  0xb2   :  { %1132 = vmatprep.subr.bf16.mxu0 %v2055_v28 }
  0xb3   :  { %1172 = vmatpush1.bf16.msra.mxu1 %v2049_v21 }
  0xb4   :  { %1173 = vmatprep.subr.bf16.mxu1 %v2057_v29 }
  0xb5   :  { %1133 = vmatpush1.bf16.msra.mxu0 %v2059_v30 }
  0xb6   :  { %1134 = vmatprep.subr.bf16.mxu0 %v2067_v32 }
  0xb7   :  { %1174 = vmatpush1.bf16.msra.mxu1 %v2061_v31 }
  0xb8   :  { %1175 = vmatprep.subr.bf16.mxu1 %v2069_v33 }
  0xb9   :  { %1135 = vmatpush1.bf16.msra.mxu0 %v2071_v34 }
  0xbb   :  { %1176 = vmatpush1.bf16.msra.mxu1 %v2073_v36 }
 0x13f   :  { %v1461_v37 = vpop.f32.mrb[0].mxu0 }
 0x140   :  { %v1462_v39 = vpop.f32.mrb[1].mxu0  ;;  %v1483_v40 = vpop.f32.mrb[0].mxu1 }
 0x141   :  { %v1463_v41 = vadd.f32 %v1462_v39, %v1461_v37  ;;  %v1464_v42 = vpop.f32.mrb[2].mxu0  ;;  %v1484_v43 = vpop.f32.mrb[1].mxu1  ;;  %v2079_v37 = vld [vmem:[#allocation9 + $0x84] ss:$16 sps:$4 sm:$0xff]   ;;  %v2081_v39 = vld [vmem:[#allocation9 + $0x8c] ss:$16 sps:$4 sm:$0xff]  }
 0x142   :  { %v1465_v44 = vpop.f32.mrb[3].mxu0  ;;  %v1485_v45 = vadd.f32 %v1484_v43, %v1483_v40  ;;  %v1486_v46 = vpop.f32.mrb[2].mxu1  ;;  %v2083_v40 = vld [vmem:[#allocation9 + $0x80] ss:$16 sps:$4 sm:$0xff]   ;;  %1136 = vmatprep.subr.bf16.mxu0 %v2079_v37  ;;  %1177 = vmatprep.subr.bf16.mxu1 %v2081_v39  ;;  %v1693_v42 = vld [vmem:[#allocation9 + $0xa4] ss:$16 sps:$4 sm:$0xff]  }
 0x143   :  { %v1487_v47 = vpop.f32.mrb[3].mxu1  ;;  %1137 = vmatpush1.bf16.msra.mxu0 %v2083_v40  ;;  %v1696_v43 = vld [vmem:[#allocation9 + $0xac] ss:$16 sps:$4 sm:$0xff]   ;;  %v1691_v44 = vld [vmem:[#allocation9 + $0xa0] ss:$16 sps:$4 sm:$0xff]  }
 0x144   :  { %v552_v48 = vadd.f32 %v1485_v45, %v1463_v41  ;;  %v2085_v41 = vld [vmem:[#allocation9 + $0x88] ss:$16 sps:$4 sm:$0xff]   ;;  %1138 = vmatprep.subr.bf16.mxu0 %v1693_v42  ;;  %v1699_v46 = vld [vmem:[#allocation9 + $0xc4] ss:$16 sps:$4 sm:$0xff]   ;;  %v1702_v47 = vld [vmem:[#allocation9 + $0xcc] ss:$16 sps:$4 sm:$0xff]  }
 0x145   :  { %1178 = vmatpush1.bf16.msra.mxu1 %v2085_v41  ;;  %v1694_v45 = vld [vmem:[#allocation9 + $0xa8] ss:$16 sps:$4 sm:$0xff]  }
 0x146   :  { %1179 = vmatprep.subr.bf16.mxu1 %v1696_v43 }
 0x147   :  { %1139 = vmatpush1.bf16.msra.mxu0 %v1691_v44 }
 0x148   :  { %1140 = vmatprep.subr.bf16.mxu0 %v1699_v46 }
 0x149   :  { %1180 = vmatpush1.bf16.msra.mxu1 %v1694_v45 }
 0x14a   :  { %1181 = vmatprep.subr.bf16.mxu1 %v1702_v47 }
 0x15f   :  { %v1505_v49 = vpop.f32.mrb[4].mxu0 }
 0x160   :  { %v1506_v50 = vpop.f32.mrb[5].mxu0 }
 0x161   :  { %v1527_v51 = vpop.f32.mrb[4].mxu1  ;;  %v1507_v52 = vadd.f32 %v1506_v50, %v1505_v49  ;;  %v1508_v53 = vpop.f32.mrb[6].mxu0  ;;  %v1700_v49 = vld [vmem:[#allocation9 + $0xc8] ss:$16 sps:$4 sm:$0xff]   ;;  %v1705_v50 = vld [vmem:[#allocation9 + $0xe4] ss:$16 sps:$4 sm:$0xff]  }
 0x162   :  { %v1528_v54 = vpop.f32.mrb[5].mxu1  ;;  %v1509_v55 = vpop.f32.mrb[7].mxu0  ;;  %1182 = vmatpush1.bf16.msra.mxu1 %v1700_v49  ;;  %v1706_v53 = vld [vmem:[#allocation9 + $0xe8] ss:$16 sps:$4 sm:$0xff]  }
 0x163   :  { %v784_v56 = vadd.f32 %v1507_v52, %v552_v48  ;;  %v1529_v57 = vadd.f32 %v1528_v54, %v1527_v51  ;;  %v1530_v58 = vpop.f32.mrb[6].mxu1  ;;  %v1697_v48 = vld [vmem:[#allocation9 + $0xc0] ss:$16 sps:$4 sm:$0xff]   ;;  %v1708_v51 = vld [vmem:[#allocation9 + $0xec] ss:$16 sps:$4 sm:$0xff]   ;;  %v1842_v54 = vmov 0  }
 0x164   :  { %v1531_v59 = vpop.f32.mrb[7].mxu1  ;;  %1141 = vmatpush1.bf16.msra.mxu0 %v1697_v48  ;;  %v1703_v52 = vld [vmem:[#allocation9 + $0xe0] ss:$16 sps:$4 sm:$0xff]   ;;  %1183 = vmatprep.subr.bf16.mxu1 %v1708_v51 }
 0x165   :  { %v824_v60 = vadd.f32 %v1529_v57, %v784_v56  ;;  %1142 = vmatprep.subr.bf16.mxu0 %v1705_v50  ;;  %1160 = vmatprep.mubr.bf16.mxu0 %v1842_v54 }
 0x166   :  { %1184 = vmatpush1.bf16.msra.mxu1 %v1706_v53  ;;  %1201 = vmatprep.mubr.bf16.mxu1 %v1842_v54 }
 0x167   :  { %1251 = vmatprep.subr.bf16.mxu1 %v2036_v18 }
 0x168   :  { %1143 = vmatpush1.bf16.msra.mxu0 %v1703_v52 }
 0x169   :  { %1210 = vmatprep.subr.bf16.mxu0 %v2032_v16 }
 0x17f   :  { %v1549_v61 = vpop.f32.mrb[8].mxu0 }
 0x180   :  { %v1550_v62 = vpop.f32.mrb[9].mxu0 }
 0x181   :  { %v1571_v63 = vpop.f32.mrb[8].mxu1  ;;  %v1551_v0 = vadd.f32 %v1550_v62, %v1549_v61  ;;  %v1552_v1 = vpop.f32.mrb[10].mxu0 }
 0x182   :  { %v1572_v2 = vpop.f32.mrb[9].mxu1  ;;  %v1553_v3 = vpop.f32.mrb[11].mxu0 }
 0x183   :  { %v1573_v4 = vadd.f32 %v1572_v2, %v1571_v63  ;;  %v1574_v5 = vpop.f32.mrb[10].mxu1 }
 0x184   :  { %v1575_v6 = vpop.f32.mrb[11].mxu1 }
 0x185   :  { %v904_v7 = vadd.f32 %v1573_v4, %v1551_v0 }
 0x187   :  { %v909_v9 = vadd.f32 %v904_v7, %v824_v60 }
 0x189   :  { %v911_v10 = vadd.f32 %v910_v8, %v909_v9 }
 0x18b   :  { %1709 = vtanh.f32 %v911_v10 }
 0x195   :  { %v1710_v12 = vpop.eup %1709 }
 0x196   :  { %v916_v13 = vsel %vm915_vm0, %v1710_v12, -1e+30 }
 0x197   :  { %v918_v14 = vsel %vm917_vm1, %v916_v13, -inf }
 0x198   :  { %919 = vmax.xlane.f32.xlu0 %v918_v14 }
 0x225   :  { %v920_v22 = vpop.xlane.xlu0 %919 }
 0x226   :  { %v921_v23 = vsub.f32 %v916_v13, %v920_v22 }
 0x228   :  { %v922_v25 = vmul.f32 1.442695, %v921_v23 }
 0x22a   :  { %1711 = vpow2.f32 %v922_v25 }
 0x234   :  { %v1712_v26 = vpop.eup %1711 }
 0x235   :  { %v924_v27 = vsel %vm917_vm1, %v1712_v26, 0.0 }
 0x236   :  { %925 = vadd.xlane.f32.xlu0 %v924_v27 }
 0x2c3   :  { %v926_v55 = vpop.xlane.xlu0 %925 }
 0x2c4   :  { %1713 = vrcp.f32 %v926_v55 }
 0x2ce   :  { %v1714_v56 = vpop.eup %1713 }
 0x2cf   :  { %v928_v57 = vmul.f32 %v1714_v56, %v926_v55 }
 0x2d1   :  { %v929_v58 = vsub.f32 2.0, %v928_v57 }
 0x2d3   :  { %v930_v59 = vmul.f32 %v1714_v56, %v929_v58 }
 0x2d5   :  { %v931_v60 = vmul.f32 %v1712_v26, %v930_v59 }
 0x2d7   :  { %v932_v61 = vpack.c.bf16 %v931_v60, %v931_v60 }
 0x2d9   :  { %v933_v62 = vunpack.c.l.bf16 %v932_v61 }
 0x2db   :  { %v934_v63 = vsub.f32 %v931_v60, %v933_v62 }
 0x2dd   :  { %v935_v0 = vpack.c.bf16 %v934_v63, %v934_v63 }
 0x2df   :  { %1161 = vmatmul.mubr.bf16.vlgmr.msra.gmra.mrb[12].mxu0 %v935_v0  ;;  %1202 = vmatmul.mubr.bf16.vlgmr.msra.gmra.mrb[12].mxu1 %v935_v0 }
 0x2e0   :  { %1211 = vmatpush1.bf16.msra.mxu0 %v2030_v15  ;;  %1252 = vmatpush1.bf16.msra.mxu1 %v2034_v17 }
 0x2e1   :  { %1212 = vmatprep.subr.bf16.mxu0 %v2038_v19  ;;  %1253 = vmatprep.subr.bf16.mxu1 %v2041_v24 }
 0x2e2   :  { %1242 = vmatprep.mubr.bf16.mxu0 %v1842_v54  ;;  %1283 = vmatprep.mubr.bf16.mxu1 %v1842_v54 }
 0x2e4   :  { %1213 = vmatpush1.bf16.msra.mxu0 %v2045_v20  ;;  %1254 = vmatpush1.bf16.msra.mxu1 %v2049_v21 }
 0x2e5   :  { %1214 = vmatprep.subr.bf16.mxu0 %v2055_v28  ;;  %1255 = vmatprep.subr.bf16.mxu1 %v2057_v29 }
 0x2e8   :  { %1215 = vmatpush1.bf16.msra.mxu0 %v2059_v30  ;;  %1256 = vmatpush1.bf16.msra.mxu1 %v2061_v31 }
 0x2e9   :  { %1216 = vmatprep.subr.bf16.mxu0 %v2067_v32  ;;  %1257 = vmatprep.subr.bf16.mxu1 %v2069_v33 }
 0x2ec   :  { %1217 = vmatpush1.bf16.msra.mxu0 %v2071_v34  ;;  %1258 = vmatpush1.bf16.msra.mxu1 %v2073_v36 }
 0x2ed   :  { %1218 = vmatprep.subr.bf16.mxu0 %v2079_v37  ;;  %1259 = vmatprep.subr.bf16.mxu1 %v2081_v39 }
 0x2f0   :  { %1219 = vmatpush1.bf16.msra.mxu0 %v2083_v40  ;;  %1260 = vmatpush1.bf16.msra.mxu1 %v2085_v41 }
 0x2f1   :  { %1220 = vmatprep.subr.bf16.mxu0 %v1693_v42  ;;  %1261 = vmatprep.subr.bf16.mxu1 %v1696_v43 }
 0x2f4   :  { %1221 = vmatpush1.bf16.msra.mxu0 %v1691_v44  ;;  %1262 = vmatpush1.bf16.msra.mxu1 %v1694_v45 }
 0x2f5   :  { %1222 = vmatprep.subr.bf16.mxu0 %v1699_v46  ;;  %1263 = vmatprep.subr.bf16.mxu1 %v1702_v47 }
 0x2f8   :  { %1223 = vmatpush1.bf16.msra.mxu0 %v1697_v48  ;;  %1264 = vmatpush1.bf16.msra.mxu1 %v1700_v49 }
 0x2f9   :  { %1224 = vmatprep.subr.bf16.mxu0 %v1705_v50  ;;  %1265 = vmatprep.subr.bf16.mxu1 %v1708_v51 }
 0x2fc   :  { %1225 = vmatpush1.bf16.msra.mxu0 %v1703_v52  ;;  %1266 = vmatpush1.bf16.msra.mxu1 %v1706_v53 }
 0x2ff   :  { %1243 = vmatmul.mubr.bf16.vlgmr.msra.gmra.mrb[12].mxu0 %v932_v61  ;;  %1284 = vmatmul.mubr.bf16.vlgmr.msra.gmra.mrb[12].mxu1 %v932_v61 }
 0x3d2   :  { %v1244_v1 = vpop.f32.mrb[12].mxu0  ;;  %v1285_v2 = vpop.f32.mrb[12].mxu1 }
 0x3d3   :  { %v1246_v3 = vpop.f32.mrb[13].mxu0  ;;  %v1287_v4 = vpop.f32.mrb[13].mxu1 }
 0x3d4   :  { %v1296_v5 = vcombine.low %v1244_v1, %v1246_v3  ;;  %v1297_v6 = vcombine.low %v1285_v2, %v1287_v4  ;;  %v1248_v7 = vpop.f32.mrb[14].mxu0  ;;  %v1289_v8 = vpop.f32.mrb[14].mxu1 }
 0x3d5   :  { %v1249_v9 = vpop.f32.mrb[15].mxu0  ;;  %v1290_v10 = vpop.f32.mrb[15].mxu1 }
 0x3d6   :  { %v1304_v11 = vrot.slane %v1296_v5, %v1929_v35  ;;  %v1311_v12 = vrot.slane %v1297_v6, %v1929_v35 }
 0x3d8   :  { %v1312_v13 = vcombine.low %v1304_v11, %v1311_v12 }
 0x3da   :  { %v1314_v14 = vmul.f32 %v1312_v13, %v1931_v38 }
 0x3dc   :  { %v1316_v15 = vrot.slane %v1314_v14, 2  ;;  %v1319_v17 = vrot.slane %v1314_v14, 4  ;;  %v1322_v19 = vrot.slane %v1314_v14, 6 }
 0x3de   :  { %v1318_v16 = vadd.f32 %v1316_v15, %v1314_v14 }
 0x3e0   :  { %v1321_v18 = vadd.f32 %v1319_v17, %v1318_v16 }
 0x3e2   :  { %v1324_v24 = vadd.f32 %v1322_v19, %v1321_v18 }
 0x3e4   :  { %1326 = vrot.lane.b32.xlu1 %v1324_v24, %s1834_s28 }
 0x456   :  { %v1327_v20 = vpop.permute.xlu1 %1326 }
 0x457   :  { %v1329_v21 = vadd.f32 %v1327_v20, %v1324_v24 }
 0x459   :  { %1331 = vst.msk [vmem:[#allocation11] sm:$0x3] %vm1330_vm2, %v1329_v21 }
 0x45a   :  { %1814 = shalt.err (!%p1811_p8)
}
 0x45b   :  { %s1815_s22 = scalar_lea.hbm %s2132_s5, 32 }
 0x45c   :  { %p1816_p9 = scmp.ne.s32.totalorder %s2132_s5, %s1815_s22  ;;  %p1819_p10 = scmp.lt.u32.totalorder %s1815_s22, %s2132_s5 }
 0x45e   :  { %p1821_p11 = pnand %p1819_p10, %p1816_p9 }
 0x460   :  { %1824 = shalt.err (!%p1821_p11)
}
 0x461   :  { %1341 = dma.vmem_to_hbm [thread:$0]  %s1339_s18, 32, %s2132_s5, [#allocation5]  }
 0x462   :  { %1831 = dma.done.wait [#allocation5], 32  }
 0x463   :  { %1832 = vsyncadd [#allocation5], 4294967264 }
 0x464   :  { %1345 = vsyncpa [#allocation4], 1 }
 0x465   :  { %1346 = vsyncpa [#allocation7], 1 }
 0x466   :  { %1347 = vsyncpa [#allocation10], 1 }
 0x467   :  { %1348 = vsyncpa [#allocation5], 1 }

</bundles_post_ra>
